<compile_context>
chip_gen: v5e
topology: v5e:2x2
jax: 0.10.0
libtpu: 0.0.40
codegen_flags: <defaults>
</compile_context>

<pallas_src>
import functools

import jax
import jax.numpy as jnp
from jax.experimental import pallas as pl
from jax.experimental.pallas import tpu as pltpu

LANE = 128  # TPU lane width: all kernel feature dims are padded to this.

try:
    _VMEM = pltpu.MemorySpace.VMEM
except AttributeError:  # fallback: let Pallas pick the default (VMEM) space
    _VMEM = None


# ----------------------------- Pallas kernel ---------------------------------

def _sage_fused_kernel(a_ref, x_ref,
                       w1_ref, b1_ref, w2_ref, b2_ref, w3_ref, b3_ref,
                       *out_refs, num_out):
    if len(out_refs) == 4:
        z_ref, y_ref, s1_ref, s2_ref = out_refs
    else:
        z_ref, y_ref = out_refs
        s1_ref = s2_ref = None

    a = a_ref[...]   # (N, N)    row-normalized adjacency, fp32
    x = x_ref[...]   # (N, 128)  zero-padded node features

    def conv(h, w_ref, b_ref):
        # SAGEConv (mean aggregation), lin_l and lin_r fused into ONE matmul:
        #     [A@h | h] @ [[W_l], [W_r]] + b
        agg = jnp.dot(a, h, preferred_element_type=jnp.float32)        # (N, 128)
        cat = jnp.concatenate([agg, h], axis=-1)                        # (N, 256)
        return jnp.dot(cat, w_ref[...],
                       preferred_element_type=jnp.float32) + b_ref[...]

    # Layer 1 (eval-mode BN folded into weights/bias) + ReLU epilogue.
    # Padded columns of the weights/bias are zero, so padded lanes stay exactly 0.
    s1 = jnp.maximum(conv(x, w1_ref, b1_ref), 0.0)
    if s1_ref is not None:
        s1_ref[...] = s1

    # Layer 2 (eval mode: T_1 == S_1).
    s2 = jnp.maximum(conv(s1, w2_ref, b2_ref), 0.0)
    if s2_ref is not None:
        s2_ref[...] = s2

    # Layer 3 (eval mode: T_2 == S_2), no BN.
    z = conv(s2, w3_ref, b3_ref)
    z_ref[...] = z

    # log_softmax epilogue over the first num_out lanes only (mask the padding).
    col = jax.lax.broadcasted_iota(jnp.int32, z.shape, 1)
    valid = col < num_out
    z_m = jnp.where(valid, z, -jnp.inf)
    m = jnp.max(z_m, axis=-1, keepdims=True)
    sh = z_m - m
    lse = jnp.log(jnp.sum(jnp.exp(sh), axis=-1, keepdims=True))
    y_ref[...] = jnp.where(valid, sh - lse, 0.0)


# ------------------------------ Wrapper ---------------------------------------

def _full_spec(shape):
    # Whole array as a single VMEM block (no grid; shapes here are small).
    return pl.BlockSpec(shape, lambda: (0,) * len(shape), memory_space=_VMEM)


def sage_fused(a, x_pad, kp, *, num_hid, num_out, return_hidden=True):
    """Single pallas_call for the full SAGE forward (eval mode)."""
    n = x_pad.shape[0]

    operands = (a, x_pad,
                kp["w1"], kp["b1"], kp["w2"], kp["b2"], kp["w3"], kp["b3"])

    out_shape = [jax.ShapeDtypeStruct((n, LANE), jnp.float32),   # z   (lane-padded)
                 jax.ShapeDtypeStruct((n, LANE), jnp.float32)]   # y   (lane-padded)
    if return_hidden:
        out_shape += [jax.ShapeDtypeStruct((n, LANE), jnp.float32),  # S_1
                      jax.ShapeDtypeStruct((n, LANE), jnp.float32)]  # S_2

    # Advisory cost estimate so XLA schedules surrounding ops around the call.
    flops = 3 * (2 * n * n * LANE + 2 * n * (2 * LANE) * LANE)
    bytes_accessed = 4 * (n * n + n * LANE                       # A, x
                          + 3 * (2 * LANE * LANE + LANE)          # weights + biases
                          + len(out_shape) * n * LANE)            # outputs
    cost = pl.CostEstimate(flops=flops, transcendentals=n * LANE,
                           bytes_accessed=bytes_accessed)

    outs = pl.pallas_call(
        functools.partial(_sage_fused_kernel, num_out=num_out),
        out_shape=tuple(out_shape),
        in_specs=[_full_spec(op.shape) for op in operands],
        out_specs=tuple(_full_spec(s.shape) for s in out_shape),
        cost_estimate=cost,
    )(*operands)

    z = outs[0][:, :num_out]
    y = outs[1][:, :num_out]
    if return_hidden:
        return z, y, (outs[2][:, :num_hid], outs[3][:, :num_hid])
    return z, y, (None, None)


# ------------------------- One-time parameter prep ----------------------------

def _fold_bn(conv_p, bn_p, eps=1e-5):
    """Fold eval-mode BatchNorm1d into the preceding conv's weights/bias."""
    s = bn_p["gamma"] * jax.lax.rsqrt(bn_p["var"] + eps)   # (1, F)
    return dict(
        w_l=conv_p["w_l"] * s,
        w_r=conv_p["w_r"] * s,
        b_l=conv_p["b_l"] * s + bn_p["beta"] - bn_p["mean"] * s,
    )


def _stack_pad(p):
    """(W_l, W_r, b_l) -> lane-padded stacked weight (2*LANE, LANE) + bias (1, LANE)."""
    f_in, f_out = p["w_l"].shape
    wl = jnp.zeros((LANE, LANE), jnp.float32).at[:f_in, :f_out].set(p["w_l"])
    wr = jnp.zeros((LANE, LANE), jnp.float32).at[:f_in, :f_out].set(p["w_r"])
    b = jnp.zeros((1, LANE), jnp.float32).at[:, :f_out].set(p["b_l"])
    return jnp.concatenate([wl, wr], axis=0), b


def prepare_kernel_params(params):
    """Done once per weight update: fold BN, stack lin_l/lin_r, pad to lane width."""
    w1, b1 = _stack_pad(_fold_bn(params["nn1"], params["bn1"]))
    w2, b2 = _stack_pad(_fold_bn(params["nn2"], params["bn2"]))
    w3, b3 = _stack_pad(params["nn3"])
    return dict(w1=w1, b1=b1, w2=w2, b2=b2, w3=w3, b3=b3)


def build_mean_adj(edge_index, num_nodes):
    """Dense row-normalized adjacency: A[i, j] = (#edges j->i) / in_degree(i).

    Built ONCE per graph (the graph is static for WikiCS) and reused across calls."""
    src, dst = edge_index[0], edge_index[1]
    adj = jnp.zeros((num_nodes, num_nodes), jnp.float32).at[dst, src].add(1.0)
    deg = adj.sum(axis=1, keepdims=True)
    return adj / jnp.maximum(deg, 1.0)


# ------------------------------ Forward ----------------------------------------

@functools.partial(jax.jit, static_argnames=("num_hid", "num_out", "return_hidden"))
def sage_forward(kparams, a, x, *, num_hid, num_out, return_hidden=True):
    n, f_in = x.shape
    x_pad = jnp.zeros((n, LANE), jnp.float32).at[:, :f_in].set(x)
    return sage_fused(a, x_pad, kparams, num_hid=num_hid, num_out=num_out,
                      return_hidden=return_hidden)


# ------------------------------ Init -------------------------------------------

def init_params(key, num_in, num_hid, num_out):
    """Deterministic parameter init.  Linear weights stored pre-transposed (F_in, F_out)."""
    ks = jax.random.split(key, 6)

    def lin(k, f_in, f_out):
        scale = 1.0 / jnp.sqrt(jnp.float32(f_in))
        return jax.random.uniform(k, (f_in, f_out), jnp.float32, -scale, scale)

    def conv(k, f_in, f_out):
        k1, k2, k3 = jax.random.split(k, 3)
        return dict(
            w_l=lin(k1, f_in, f_out),   # lin_l (aggregated messages), has bias
            w_r=lin(k2, f_in, f_out),   # lin_r (root), no bias
            b_l=jax.random.uniform(k3, (1, f_out), jnp.float32, -0.1, 0.1),
        )

    def bn(k, f):
        k1, k2, k3 = jax.random.split(k, 3)
        return dict(
            gamma=1.0 + 0.1 * jax.random.normal(k1, (1, f), jnp.float32),
            beta=0.1 * jax.random.normal(k2, (1, f), jnp.float32),
            mean=0.05 * jax.random.normal(k3, (1, f), jnp.float32),
            var=jnp.ones((1, f), jnp.float32),
        )

    return dict(
        nn1=conv(ks[0], num_in, num_hid),
        nn2=conv(ks[1], num_hid, num_hid),
        nn3=conv(ks[2], num_hid, num_out),
        bn1=bn(ks[3], num_hid),
        bn2=bn(ks[4], num_hid),
    )


# ------------------------------ Reference (plain JAX) -------------------------

def sage_forward_ref(params, x, edge_index, num_nodes):
    a = build_mean_adj(edge_index, num_nodes)

    def conv(p, a, x):
        return (a @ x) @ p["w_l"] + x @ p["w_r"] + p["b_l"]

    def bnr(p, x):
        return jnp.maximum(
            (x - p["mean"]) * jax.lax.rsqrt(p["var"] + 1e-5) * p["gamma"] + p["beta"], 0.0)

    s1 = bnr(params["bn1"], conv(params["nn1"], a, x))
    s2 = bnr(params["bn2"], conv(params["nn2"], a, s1))
    z = conv(params["nn3"], a, s2)
    y = jax.nn.log_softmax(z, axis=-1)
    return z, y, (s1, s2)


# ------------------------------ Main -------------------------------------------

if __name__ == "__main__":
    key = jax.random.PRNGKey(0)
    k_param, k_x, k_src, k_dst = jax.random.split(key, 4)

    num_nodes = 64
    num_edges = 256
    num_in, num_hid, num_out = 16, 32, 8

    params = init_params(k_param, num_in, num_hid, num_out)
    x = jax.random.normal(k_x, (num_nodes, num_in), jnp.float32)
    edge_index = jnp.stack([
        jax.random.randint(k_src, (num_edges,), 0, num_nodes),
        jax.random.randint(k_dst, (num_edges,), 0, num_nodes),
    ], axis=0)

    # One-time prep (hoisted out of the per-call path).
    a = build_mean_adj(edge_index, num_nodes)
    kparams = prepare_kernel_params(params)

    z, y_pred, (s1, s2) = sage_forward(kparams, a, x,
                                       num_hid=num_hid, num_out=num_out,
                                       return_hidden=True)
    jax.block_until_ready((z, y_pred, s1, s2))

    z_r, y_r, (s1_r, s2_r) = sage_forward_ref(params, x, edge_index, num_nodes)
    assert jnp.allclose(z, z_r, atol=1e-4), "z mismatch"
    assert jnp.allclose(y_pred, y_r, atol=1e-4), "y_pred mismatch"
    assert jnp.allclose(s1, s1_r, atol=1e-4), "S_1 mismatch"
    assert jnp.allclose(s2, s2_r, atol=1e-4), "S_2 mismatch"

    print("KERNEL_OK")
</pallas_src>

<mosaic_0001>
module attributes {stable_mosaic.version = 11 : i64} {
  func.func @_sage_fused_kernel(%arg0: memref<64x64xf32, #tpu.memory_space<vmem>>, %arg1: memref<64x128xf32, #tpu.memory_space<vmem>>, %arg2: memref<256x128xf32, #tpu.memory_space<vmem>>, %arg3: memref<1x128xf32, #tpu.memory_space<vmem>>, %arg4: memref<256x128xf32, #tpu.memory_space<vmem>>, %arg5: memref<1x128xf32, #tpu.memory_space<vmem>>, %arg6: memref<256x128xf32, #tpu.memory_space<vmem>>, %arg7: memref<1x128xf32, #tpu.memory_space<vmem>>, %arg8: memref<64x128xf32, #tpu.memory_space<vmem>>, %arg9: memref<64x128xf32, #tpu.memory_space<vmem>>, %arg10: memref<64x128xf32, #tpu.memory_space<vmem>>, %arg11: memref<64x128xf32, #tpu.memory_space<vmem>>) attributes {dimension_semantics = [], scalar_prefetch = 0 : i64, scratch_operands = 0 : i64, tpu.core_type = #tpu.core_type<tc>} {
    %c0 = arith.constant 0 : index
    %c0_0 = arith.constant 0 : index
    %0 = vector.load %arg0[%c0, %c0_0] : memref<64x64xf32, #tpu.memory_space<vmem>>, vector<64x64xf32>
    %c0_1 = arith.constant 0 : index
    %c0_2 = arith.constant 0 : index
    %1 = vector.load %arg1[%c0_1, %c0_2] : memref<64x128xf32, #tpu.memory_space<vmem>>, vector<64x128xf32>
    %cst = arith.constant dense<0.000000e+00> : vector<64x128xf32>
    %2 = tpu.matmul %0, %1, %cst {dimension_numbers = #tpu.dot_dimension_numbers<[1], [0], [0], [1], [0, 0, 1, 1], [], []>} : vector<64x64xf32>, vector<64x128xf32>, vector<64x128xf32> -> vector<64x128xf32>
    %3 = tpu.concatenate %2, %1 in 1 : vector<64x128xf32>, vector<64x128xf32> -> vector<64x256xf32>
    %c0_3 = arith.constant 0 : index
    %c0_4 = arith.constant 0 : index
    %4 = vector.load %arg2[%c0_3, %c0_4] : memref<256x128xf32, #tpu.memory_space<vmem>>, vector<256x128xf32>
    %cst_5 = arith.constant dense<0.000000e+00> : vector<64x128xf32>
    %5 = tpu.matmul %3, %4, %cst_5 {dimension_numbers = #tpu.dot_dimension_numbers<[1], [0], [0], [1], [0, 0, 1, 1], [], []>} : vector<64x256xf32>, vector<256x128xf32>, vector<64x128xf32> -> vector<64x128xf32>
    %c0_6 = arith.constant 0 : index
    %c0_7 = arith.constant 0 : index
    %6 = vector.load %arg3[%c0_6, %c0_7] : memref<1x128xf32, #tpu.memory_space<vmem>>, vector<1x128xf32>
    %7 = vector.broadcast %6 : vector<1x128xf32> to vector<64x128xf32>
    %8 = arith.addf %5, %7 : vector<64x128xf32>
    %cst_8 = arith.constant 0.000000e+00 : f32
    %9 = vector.broadcast %cst_8 : f32 to vector<64x128xf32>
    %10 = arith.maximumf %8, %9 : vector<64x128xf32>
    %c0_9 = arith.constant 0 : index
    %c0_10 = arith.constant 0 : index
    %11 = vector.load %arg10[%c0_9, %c0_10] : memref<64x128xf32, #tpu.memory_space<vmem>>, vector<64x128xf32>
    tpu.vector_store %arg10[%c0_9, %c0_10], %10 {strides = array<i32>} : memref<64x128xf32, #tpu.memory_space<vmem>>, vector<64x128xf32>,
    %cst_11 = arith.constant dense<0.000000e+00> : vector<64x128xf32>
    %12 = tpu.matmul %0, %10, %cst_11 {dimension_numbers = #tpu.dot_dimension_numbers<[1], [0], [0], [1], [0, 0, 1, 1], [], []>} : vector<64x64xf32>, vector<64x128xf32>, vector<64x128xf32> -> vector<64x128xf32>
    %13 = tpu.concatenate %12, %10 in 1 : vector<64x128xf32>, vector<64x128xf32> -> vector<64x256xf32>
    %c0_12 = arith.constant 0 : index
    %c0_13 = arith.constant 0 : index
    %14 = vector.load %arg4[%c0_12, %c0_13] : memref<256x128xf32, #tpu.memory_space<vmem>>, vector<256x128xf32>
    %cst_14 = arith.constant dense<0.000000e+00> : vector<64x128xf32>
    %15 = tpu.matmul %13, %14, %cst_14 {dimension_numbers = #tpu.dot_dimension_numbers<[1], [0], [0], [1], [0, 0, 1, 1], [], []>} : vector<64x256xf32>, vector<256x128xf32>, vector<64x128xf32> -> vector<64x128xf32>
    %c0_15 = arith.constant 0 : index
    %c0_16 = arith.constant 0 : index
    %16 = vector.load %arg5[%c0_15, %c0_16] : memref<1x128xf32, #tpu.memory_space<vmem>>, vector<1x128xf32>
    %17 = vector.broadcast %16 : vector<1x128xf32> to vector<64x128xf32>
    %18 = arith.addf %15, %17 : vector<64x128xf32>
    %cst_17 = arith.constant 0.000000e+00 : f32
    %19 = vector.broadcast %cst_17 : f32 to vector<64x128xf32>
    %20 = arith.maximumf %18, %19 : vector<64x128xf32>
    %c0_18 = arith.constant 0 : index
    %c0_19 = arith.constant 0 : index
    %21 = vector.load %arg11[%c0_18, %c0_19] : memref<64x128xf32, #tpu.memory_space<vmem>>, vector<64x128xf32>
    tpu.vector_store %arg11[%c0_18, %c0_19], %20 {strides = array<i32>} : memref<64x128xf32, #tpu.memory_space<vmem>>, vector<64x128xf32>,
    %cst_20 = arith.constant dense<0.000000e+00> : vector<64x128xf32>
    %22 = tpu.matmul %0, %20, %cst_20 {dimension_numbers = #tpu.dot_dimension_numbers<[1], [0], [0], [1], [0, 0, 1, 1], [], []>} : vector<64x64xf32>, vector<64x128xf32>, vector<64x128xf32> -> vector<64x128xf32>
    %23 = tpu.concatenate %22, %20 in 1 : vector<64x128xf32>, vector<64x128xf32> -> vector<64x256xf32>
    %c0_21 = arith.constant 0 : index
    %c0_22 = arith.constant 0 : index
    %24 = vector.load %arg6[%c0_21, %c0_22] : memref<256x128xf32, #tpu.memory_space<vmem>>, vector<256x128xf32>
    %cst_23 = arith.constant dense<0.000000e+00> : vector<64x128xf32>
    %25 = tpu.matmul %23, %24, %cst_23 {dimension_numbers = #tpu.dot_dimension_numbers<[1], [0], [0], [1], [0, 0, 1, 1], [], []>} : vector<64x256xf32>, vector<256x128xf32>, vector<64x128xf32> -> vector<64x128xf32>
    %c0_24 = arith.constant 0 : index
    %c0_25 = arith.constant 0 : index
    %26 = vector.load %arg7[%c0_24, %c0_25] : memref<1x128xf32, #tpu.memory_space<vmem>>, vector<1x128xf32>
    %27 = vector.broadcast %26 : vector<1x128xf32> to vector<64x128xf32>
    %28 = arith.addf %25, %27 : vector<64x128xf32>
    %c0_26 = arith.constant 0 : index
    %c0_27 = arith.constant 0 : index
    %29 = vector.load %arg8[%c0_26, %c0_27] : memref<64x128xf32, #tpu.memory_space<vmem>>, vector<64x128xf32>
    tpu.vector_store %arg8[%c0_26, %c0_27], %28 {strides = array<i32>} : memref<64x128xf32, #tpu.memory_space<vmem>>, vector<64x128xf32>,
    %30 = tpu.iota {dimensions = array<i32: 1>} : vector<64x128xi32>
    %c8_i32 = arith.constant 8 : i32
    %31 = vector.broadcast %c8_i32 : i32 to vector<64x128xi32>
    %32 = arith.cmpi slt, %30, %31 : vector<64x128xi32>
    %cst_28 = arith.constant 0xFF800000 : f32
    %33 = vector.broadcast %cst_28 : f32 to vector<64x128xf32>
    %34 = arith.select %32, %28, %33 : vector<64x128xi1>, vector<64x128xf32>
    %cst_29 = arith.constant dense<0xFF800000> : vector<64xf32>
    %35 = vector.multi_reduction <maximumf>, %34, %cst_29 [1] : vector<64x128xf32> to vector<64xf32>
    %36 = vector.shape_cast %35 : vector<64xf32> to vector<64x1xf32>
    %37 = vector.broadcast %36 : vector<64x1xf32> to vector<64x128xf32>
    %38 = arith.subf %34, %37 : vector<64x128xf32>
    %39 = math.exp %38 : vector<64x128xf32>
    %cst_30 = arith.constant dense<0.000000e+00> : vector<64xf32>
    %40 = vector.multi_reduction <add>, %39, %cst_30 [1] : vector<64x128xf32> to vector<64xf32>
    %41 = vector.shape_cast %40 : vector<64xf32> to vector<64x1xf32>
    %42 = math.log %41 : vector<64x1xf32>
    %43 = vector.broadcast %42 : vector<64x1xf32> to vector<64x128xf32>
    %44 = arith.subf %38, %43 : vector<64x128xf32>
    %cst_31 = arith.constant 0.000000e+00 : f32
    %45 = vector.broadcast %cst_31 : f32 to vector<64x128xf32>
    %46 = arith.select %32, %44, %45 : vector<64x128xi1>, vector<64x128xf32>
    %c0_32 = arith.constant 0 : index
    %c0_33 = arith.constant 0 : index
    %47 = vector.load %arg9[%c0_32, %c0_33] : memref<64x128xf32, #tpu.memory_space<vmem>>, vector<64x128xf32>
    tpu.vector_store %arg9[%c0_32, %c0_33], %46 {strides = array<i32>} : memref<64x128xf32, #tpu.memory_space<vmem>>, vector<64x128xf32>,
    return
  }
}

</mosaic_0001>

<bundles_post_ra>
// kernel: sage_forward.1
= control target key start
LH: loop header
LB: loop body
LE: loop exit
PB: predicated region body
PF: predicated region fallthrough
CT: control target
= control target key end

     0   :  { %17 = vsyncpa [#allocation3], 0  ;;  %s1453_s0 = inlined_call_operand.vmem [shape: f32[64,64], index: 0, kind: input, shape index: {}]   ;;  %s1454_s1 = inlined_call_operand.vmem [shape: f32[64,128], index: 1, kind: input, shape index: {}]   ;;  %s1455_s2 = inlined_call_operand.vmem [shape: f32[256,128], index: 2, kind: input, shape index: {}]   ;;  %s1456_s3 = inlined_call_operand.vmem [shape: f32[1,128], index: 3, kind: input, shape index: {}]   ;;  %s1457_s4 = inlined_call_operand.hbm [shape: f32[256,128], index: 4, kind: input, shape index: {}]   ;;  %s1458_s5 = inlined_call_operand.vmem [shape: f32[1,128], index: 5, kind: input, shape index: {}]   ;;  %s1459_s6 = inlined_call_operand.hbm [shape: f32[256,128], index: 6, kind: input, shape index: {}]   ;;  %s1460_s7 = inlined_call_operand.vmem [shape: f32[1,128], index: 7, kind: input, shape index: {}]   ;;  %s1461_s8 = inlined_call_operand.vmem [shape: f32[64,128], index: 8, kind: output, shape index: {0}]   ;;  %s1462_s9 = inlined_call_operand.vmem [shape: f32[64,128], index: 9, kind: output, shape index: {1}]   ;;  %s1463_s10 = inlined_call_operand.vmem [shape: f32[64,128], index: 10, kind: output, shape index: {2}]   ;;  %s1464_s11 = inlined_call_operand.vmem [shape: f32[64,128], index: 11, kind: output, shape index: {3}]  }
   0x1   :  { %s31_s19 = sshll.u32 %s1457_s4, 4  ;;  %s32_s19 = int_to_ptr.hbm [resolvable:$true] %s31_s19 }
   0x2   :  { %18 = vsyncpa [#allocation5], 0  ;;  %s887_s20 = smov [#allocation2]   ;;  %s46_s24 = sshll.u32 %s1459_s6, 4  ;;  %s47_s24 = int_to_ptr.hbm [resolvable:$true] %s46_s24 }
   0x3   :  { %s33_s21 = sshll.u32 %s887_s20, 4  ;;  %s888_s25 = smov 128   ;;  %s34_s21 = int_to_ptr.vmem [resolvable:$true] %s33_s21 }
   0x4   :  { %s889_s26 = smov 8   ;;  %s890_s27 = smov [#allocation4]  }
   0x5   :  { %39 = dma.hbm_to_vmem [thread:$0]  %s32_s19, 4096, %s34_s21, [#allocation3], %s888_s25, %s888_s25, %s889_s26  }
   0x6   :  { %s48_s28 = sshll.u32 %s890_s27, 4  ;;  %s49_s28 = int_to_ptr.vmem [resolvable:$true] %s48_s28 }
   0x7   :  { %54 = dma.hbm_to_vmem [thread:$0]  %s47_s24, 4096, %s49_s28, [#allocation5], %s888_s25, %s888_s25, %s889_s26  }
   0x8   :  { %883 = dma.done.wait [#allocation3], 4096  }
   0x9   :  { %884 = vsyncadd [#allocation3], 4294963200 }
   0xa   :  { %885 = dma.done.wait [#allocation5], 4096  }
   0xb   :  { %886 = vsyncadd [#allocation5], 4294963200  ;;  %v960_v0 = vld [vmem:[%s1454_s1 + $0x38] sm:$0xff]  ;;  %v965_v1 = vld [vmem:[%s1454_s1 + $0x30] sm:$0xff]  ;;  %vm81_vm0 = vcmask 523264  }
   0xc   :  { %114 = vmatpush.msra.mxu0 %v960_v0  ;;  %772 = vmatpush.msra.mxu3 %v960_v0  ;;  %v972_v2 = vld [vmem:[%s1454_s1 + $0x28] sm:$0xff]  ;;  %v978_v3 = vld [vmem:[%s1454_s1 + $0x20] sm:$0xff]  ;;  %v986_v4 = vld [vmem:[%s1454_s1 + $0x18] sm:$0xff] }
   0xd   :  { %v993_v5 = vld [vmem:[%s1454_s1 + $0x10] sm:$0xff]  ;;  %v178_v6 = vld [vmem:[%s1455_s2 + $0xf8] sm:$0xff]  ;;  %v1006_v8 = vld [vmem:[%s1454_s1 + $0x8] sm:$0xff] }
   0xe   :  { %115 = vmatpush.msra.mxu0 %v965_v1  ;;  %773 = vmatpush.msra.mxu3 %v965_v1  ;;  %v177_v7 = vld [vmem:[%s1455_s2 + $0xf0] sm:$0xff]  ;;  %v162_v9 = vld [vmem:[%s1455_s2 + $0x78] sm:$0xff]  ;;  %v176_v10 = vld [vmem:[%s1455_s2 + $0xe8] sm:$0xff] }
   0xf   :  { %224 = vmatpush.msra.mxu2 %v178_v6  ;;  %v161_v11 = vld [vmem:[%s1455_s2 + $0x70] sm:$0xff]  ;;  %v1022_v12 = vld [vmem:[%s1454_s1] sm:$0xff]  ;;  %183 = vmatpush.msra.mxu1 %v162_v9  ;;  %v160_v16 = vld [vmem:[%s1455_s2 + $0x68] sm:$0xff] }
  0x10   :  { %116 = vmatpush.msra.mxu0 %v972_v2  ;;  %774 = vmatpush.msra.mxu3 %v972_v2  ;;  %v1028_v13 = vld [vmem:[%s1453_s0] sm:$0xff]  ;;  %v174_v17 = vld [vmem:[%s1455_s2 + $0xd8] sm:$0xff]  ;;  %v173_v19 = vld [vmem:[%s1455_s2 + $0xd0] sm:$0xff] }
  0x11   :  { %225 = vmatpush.msra.mxu2 %v177_v7  ;;  %v1034_v14 = vld [vmem:[%s1453_s0 + $0x20] sm:$0xff]  ;;  %184 = vmatpush.msra.mxu1 %v161_v11  ;;  %v158_v20 = vld [vmem:[%s1455_s2 + $0x58] sm:$0xff]  ;;  %v172_v21 = vld [vmem:[%s1455_s2 + $0xc8] sm:$0xff] }
  0x12   :  { %117 = vmatpush.msra.mxu0 %v978_v3  ;;  %775 = vmatpush.msra.mxu3 %v978_v3  ;;  %v175_v15 = vld [vmem:[%s1455_s2 + $0xe0] sm:$0xff]  ;;  %v157_v22 = vld [vmem:[%s1455_s2 + $0x50] sm:$0xff]  ;;  %v1069_v23 = vld [vmem:[%s1453_s0 + $0x8] sm:$0xff] }
  0x13   :  { %226 = vmatpush.msra.mxu2 %v176_v10  ;;  %v159_v18 = vld [vmem:[%s1455_s2 + $0x60] sm:$0xff]  ;;  %185 = vmatpush.msra.mxu1 %v160_v16  ;;  %v1074_v24 = vld [vmem:[%s1453_s0 + $0x28] sm:$0xff]  ;;  %v170_v27 = vld [vmem:[%s1455_s2 + $0xb8] sm:$0xff] }
  0x14   :  { %118 = vmatpush.msra.mxu0 %v986_v4  ;;  %776 = vmatpush.msra.mxu3 %v986_v4  ;;  %v171_v25 = vld [vmem:[%s1455_s2 + $0xc0] sm:$0xff]  ;;  %v156_v26 = vld [vmem:[%s1455_s2 + $0x48] sm:$0xff]  ;;  %v169_v29 = vld [vmem:[%s1455_s2 + $0xb0] sm:$0xff] }
  0x15   :  { %227 = vmatpush.msra.mxu2 %v175_v15  ;;  %186 = vmatpush.msra.mxu1 %v159_v18  ;;  %v155_v28 = vld [vmem:[%s1455_s2 + $0x40] sm:$0xff]  ;;  %v154_v30 = vld [vmem:[%s1455_s2 + $0x38] sm:$0xff]  ;;  %v168_v31 = vld [vmem:[%s1455_s2 + $0xa8] sm:$0xff] }
  0x16   :  { %119 = vmatpush.msra.mxu0 %v993_v5  ;;  %777 = vmatpush.msra.mxu3 %v993_v5  ;;  %v153_v32 = vld [vmem:[%s1455_s2 + $0x30] sm:$0xff]  ;;  %v167_v35 = vld [vmem:[%s1455_s2 + $0xa0] sm:$0xff]  ;;  %v152_v36 = vld [vmem:[%s1455_s2 + $0x28] sm:$0xff] }
  0x17   :  { %228 = vmatpush.msra.mxu2 %v174_v17  ;;  %187 = vmatpush.msra.mxu1 %v158_v20  ;;  %v1107_v33 = vld [vmem:[%s1453_s0 + $0x10] sm:$0xff]  ;;  %v166_v37 = vld [vmem:[%s1455_s2 + $0x98] sm:$0xff]  ;;  %v151_v38 = vld [vmem:[%s1455_s2 + $0x20] sm:$0xff] }
  0x18   :  { %120 = vmatpush.msra.mxu0 %v1006_v8  ;;  %778 = vmatpush.msra.mxu3 %v1006_v8  ;;  %v1112_v34 = vld [vmem:[%s1453_s0 + $0x30] sm:$0xff]  ;;  %v150_v40 = vld [vmem:[%s1455_s2 + $0x18] sm:$0xff]  ;;  %v164_v41 = vld [vmem:[%s1455_s2 + $0x88] sm:$0xff] }
  0x19   :  { %229 = vmatpush.msra.mxu2 %v173_v19  ;;  %188 = vmatpush.msra.mxu1 %v157_v22  ;;  %v165_v39 = vld [vmem:[%s1455_s2 + $0x90] sm:$0xff]  ;;  %v1145_v43 = vld [vmem:[%s1453_s0 + $0x18] sm:$0xff]  ;;  %v163_v45 = vld [vmem:[%s1455_s2 + $0x80] sm:$0xff] }
  0x1a   :  { %121 = vmatpush.msra.mxu0 %v1022_v12  ;;  %779 = vmatpush.msra.mxu3 %v1022_v12  ;;  %v149_v42 = vld [vmem:[%s1455_s2 + $0x10] sm:$0xff]  ;;  %v1150_v44 = vld [vmem:[%s1453_s0 + $0x38] sm:$0xff]  ;;  %v148_v46 = vld [vmem:[%s1455_s2 + $0x8] sm:$0xff] }
  0x1b   :  { %748 = vmatmul.msk.f32.vlgmr.msra.gmra.mxu0 %vm81_vm0, %v1028_v13  ;;  %752 = vmatmul.msk.f32.vlgmr.msra.gmra.mxu3 %vm81_vm0, %v1034_v14  ;;  %v147_v47 = vld [vmem:[%s1455_s2] sm:$0xff] }
  0x1c   :  { %230 = vmatpush.msra.mxu2 %v172_v21  ;;  %189 = vmatpush.msra.mxu1 %v156_v26  ;;  %v800_v58 = vld [vmem:[%s1456_s3] ss:$0 sm:$0xff] }
  0x1e   :  { %231 = vmatpush.msra.mxu2 %v171_v25  ;;  %190 = vmatpush.msra.mxu1 %v155_v28 }
  0x20   :  { %232 = vmatpush.msra.mxu2 %v170_v27  ;;  %191 = vmatpush.msra.mxu1 %v154_v30 }
  0x22   :  { %233 = vmatpush.msra.mxu2 %v169_v29  ;;  %192 = vmatpush.msra.mxu1 %v153_v32 }
  0x23   :  { %749 = vmatmul.msk.f32.gmra.mxu0 %vm81_vm0, %v1069_v23  ;;  %753 = vmatmul.msk.f32.gmra.mxu3 %vm81_vm0, %v1074_v24 }
  0x24   :  { %234 = vmatpush.msra.mxu2 %v168_v31  ;;  %193 = vmatpush.msra.mxu1 %v152_v36 }
  0x26   :  { %235 = vmatpush.msra.mxu2 %v167_v35  ;;  %194 = vmatpush.msra.mxu1 %v151_v38 }
  0x28   :  { %236 = vmatpush.msra.mxu2 %v166_v37  ;;  %195 = vmatpush.msra.mxu1 %v150_v40  ;;  %v352_v40 = vld [vmem:[#allocation2 + $0xf0] sm:$0xff] }
  0x2a   :  { %237 = vmatpush.msra.mxu2 %v165_v39  ;;  %196 = vmatpush.msra.mxu1 %v149_v42  ;;  %v353_v39 = vld [vmem:[#allocation2 + $0xf8] sm:$0xff]  ;;  %v350_v42 = vld [vmem:[#allocation2 + $0xe0] sm:$0xff] }
  0x2b   :  { %750 = vmatmul.msk.f32.gmra.mxu0 %vm81_vm0, %v1107_v33  ;;  %754 = vmatmul.msk.f32.gmra.mxu3 %vm81_vm0, %v1112_v34 }
  0x2c   :  { %238 = vmatpush.msra.mxu2 %v164_v41  ;;  %197 = vmatpush.msra.mxu1 %v148_v46  ;;  %v351_v41 = vld [vmem:[#allocation2 + $0xe8] sm:$0xff]  ;;  %v348_v46 = vld [vmem:[#allocation2 + $0xd0] sm:$0xff] }
  0x2e   :  { %239 = vmatpush.msra.mxu2 %v163_v45  ;;  %198 = vmatpush.msra.mxu1 %v147_v47  ;;  %v349_v45 = vld [vmem:[#allocation2 + $0xd8] sm:$0xff]  ;;  %v347_v47 = vld [vmem:[#allocation2 + $0xc8] sm:$0xff] }
  0x2f   :  { %240 = vmatmul.f32.vlgmr.msra.gmra.mxu2 %v1022_v12 }
  0x33   :  { %751 = vmatmul.msk.f32.gmra.mxu0 %vm81_vm0, %v1145_v43  ;;  %755 = vmatmul.msk.f32.gmra.mxu3 %vm81_vm0, %v1150_v44 }
  0x37   :  { %243 = vmatmul.f32.gmra.mxu2 %v1006_v8 }
  0x3f   :  { %246 = vmatmul.f32.gmra.mxu2 %v993_v5 }
  0x47   :  { %249 = vmatmul.f32.gmra.mxu2 %v986_v4 }
  0x4f   :  { %252 = vmatmul.f32.gmra.mxu2 %v978_v3 }
  0x57   :  { %255 = vmatmul.f32.gmra.mxu2 %v972_v2 }
  0x5f   :  { %258 = vmatmul.f32.gmra.mxu2 %v965_v1 }
  0x67   :  { %261 = vmatmul.f32.gmra.mxu2 %v960_v0 }
  0x98   :  { %v123_v48 = vpop.f32.mrf.mxu0 }
  0x99   :  { %199 = vmatmul.f32.vlgmr.msra.gmra.mxu1 %v123_v48  ;;  %v346_v48 = vld [vmem:[#allocation2 + $0xc0] sm:$0xff] }
  0x9e   :  { %v135_v52 = vpop.f32.mrf.mxu3 }
  0xa0   :  { %v126_v49 = vpop.f32.mrf.mxu0 }
  0xa1   :  { %202 = vmatmul.f32.gmra.mxu1 %v126_v49  ;;  %v345_v49 = vld [vmem:[#allocation2 + $0xb8] sm:$0xff] }
  0xa6   :  { %v138_v53 = vpop.f32.mrf.mxu3 }
  0xa8   :  { %v129_v50 = vpop.f32.mrf.mxu0 }
  0xa9   :  { %205 = vmatmul.f32.gmra.mxu1 %v129_v50  ;;  %v344_v50 = vld [vmem:[#allocation2 + $0xb0] sm:$0xff] }
  0xae   :  { %v141_v54 = vpop.f32.mrf.mxu3 }
  0xb0   :  { %v132_v51 = vpop.f32.mrf.mxu0 }
  0xb1   :  { %208 = vmatmul.f32.gmra.mxu1 %v132_v51  ;;  %v343_v51 = vld [vmem:[#allocation2 + $0xa8] sm:$0xff] }
  0xb2   :  { %v241_v56 = vpop.f32.mrf.mxu2 }
  0xb6   :  { %v144_v55 = vpop.f32.mrf.mxu3 }
  0xb9   :  { %211 = vmatmul.f32.gmra.mxu1 %v135_v52  ;;  %v342_v52 = vld [vmem:[#allocation2 + $0xa0] sm:$0xff] }
  0xba   :  { %v244_v57 = vpop.f32.mrf.mxu2 }
  0xc1   :  { %214 = vmatmul.f32.gmra.mxu1 %v138_v53  ;;  %v341_v53 = vld [vmem:[#allocation2 + $0x98] sm:$0xff] }
  0xc2   :  { %v247_v63 = vpop.f32.mrf.mxu2 }
  0xc9   :  { %217 = vmatmul.f32.gmra.mxu1 %v141_v54  ;;  %v340_v54 = vld [vmem:[#allocation2 + $0x90] sm:$0xff] }
  0xca   :  { %v250_v5 = vpop.f32.mrf.mxu2 }
  0xd1   :  { %220 = vmatmul.f32.gmra.mxu1 %v144_v55  ;;  %v339_v55 = vld [vmem:[#allocation2 + $0x88] sm:$0xff] }
  0xd2   :  { %v253_v11 = vpop.f32.mrf.mxu2 }
  0xda   :  { %v256_v19 = vpop.f32.mrf.mxu2 }
  0xe2   :  { %v259_v27 = vpop.f32.mrf.mxu2 }
  0xea   :  { %v262_v35 = vpop.f32.mrf.mxu2 }
 0x116   :  { %v200_v59 = vpop.f32.mrf.mxu1 }
 0x117   :  { %v201_v60 = vadd.f32 %v800_v58, %v200_v59  ;;  %v335_v59 = vld [vmem:[#allocation2 + $0x68] sm:$0xff] }
 0x119   :  { %v242_v61 = vadd.f32 %v241_v56, %v201_v60  ;;  %v338_v56 = vld [vmem:[#allocation2 + $0x80] sm:$0xff] }
 0x11a   :  { %v334_v60 = vld [vmem:[#allocation2 + $0x60] sm:$0xff] }
 0x11b   :  { %v1176_v62 = vmax.f32 %v242_v61, 0.0  ;;  %v333_v61 = vld [vmem:[#allocation2 + $0x58] sm:$0xff] }
 0x11d   :  { %273 = vst [vmem:[%s1463_s10] sm:$0xff] %v1176_v62 }
 0x11e   :  { %v203_v0 = vpop.f32.mrf.mxu1 }
 0x11f   :  { %v204_v1 = vadd.f32 %v800_v58, %v203_v0  ;;  %v331_v0 = vld [vmem:[#allocation2 + $0x48] sm:$0xff] }
 0x121   :  { %v245_v2 = vadd.f32 %v244_v57, %v204_v1  ;;  %v337_v57 = vld [vmem:[#allocation2 + $0x78] sm:$0xff]  ;;  %v330_v1 = vld [vmem:[#allocation2 + $0x40] sm:$0xff] }
 0x122   :  { %358 = vmatpush.msrb.mxu0 %v337_v57 }
 0x123   :  { %v1182_v3 = vmax.f32 %v245_v2, 0.0  ;;  %v328_v2 = vld [vmem:[#allocation2 + $0x30] sm:$0xff] }
 0x125   :  { %274 = vst [vmem:[%s1463_s10 + $0x8] sm:$0xff] %v1182_v3 }
 0x126   :  { %v206_v4 = vpop.f32.mrf.mxu1 }
 0x127   :  { %v207_v6 = vadd.f32 %v800_v58, %v206_v4  ;;  %v326_v4 = vld [vmem:[#allocation2 + $0x20] sm:$0xff] }
 0x129   :  { %v248_v7 = vadd.f32 %v247_v63, %v207_v6  ;;  %v332_v63 = vld [vmem:[#allocation2 + $0x50] sm:$0xff] }
 0x12a   :  { %v324_v6 = vld [vmem:[#allocation2 + $0x10] sm:$0xff] }
 0x12b   :  { %v1188_v8 = vmax.f32 %v248_v7, 0.0  ;;  %v323_v7 = vld [vmem:[#allocation2 + $0x8] sm:$0xff] }
 0x12d   :  { %275 = vst [vmem:[%s1463_s10 + $0x10] sm:$0xff] %v1188_v8 }
 0x12e   :  { %v209_v9 = vpop.f32.mrf.mxu1 }
 0x12f   :  { %v210_v10 = vadd.f32 %v800_v58, %v209_v9 }
 0x131   :  { %v251_v12 = vadd.f32 %v250_v5, %v210_v10  ;;  %v325_v5 = vld [vmem:[#allocation2 + $0x18] sm:$0xff] }
 0x133   :  { %v1194_v15 = vmax.f32 %v251_v12, 0.0 }
 0x135   :  { %276 = vst [vmem:[%s1463_s10 + $0x18] sm:$0xff] %v1194_v15 }
 0x136   :  { %v212_v16 = vpop.f32.mrf.mxu1 }
 0x137   :  { %v213_v17 = vadd.f32 %v800_v58, %v212_v16 }
 0x139   :  { %v254_v18 = vadd.f32 %v253_v11, %v213_v17 }
 0x13b   :  { %v1200_v20 = vmax.f32 %v254_v18, 0.0 }
 0x13d   :  { %277 = vst [vmem:[%s1463_s10 + $0x20] sm:$0xff] %v1200_v20 }
 0x13e   :  { %v215_v21 = vpop.f32.mrf.mxu1 }
 0x13f   :  { %v216_v22 = vadd.f32 %v800_v58, %v215_v21  ;;  %v1262_v21 = vld [vmem:[#allocation4 + $0xe8] sm:$0xff] }
 0x141   :  { %v257_v25 = vadd.f32 %v256_v19, %v216_v22  ;;  %v1256_v19 = vld [vmem:[#allocation4 + $0xf8] sm:$0xff]  ;;  %v1264_v22 = vld [vmem:[#allocation4 + $0xe0] sm:$0xff] }
 0x143   :  { %v1206_v26 = vmax.f32 %v257_v25, 0.0  ;;  %v1267_v25 = vld [vmem:[#allocation4 + $0xd8] sm:$0xff] }
 0x145   :  { %278 = vst [vmem:[%s1463_s10 + $0x28] sm:$0xff] %v1206_v26 }
 0x146   :  { %v218_v28 = vpop.f32.mrf.mxu1 }
 0x147   :  { %v219_v29 = vadd.f32 %v800_v58, %v218_v28  ;;  %v1276_v28 = vld [vmem:[#allocation4 + $0xc0] sm:$0xff] }
 0x149   :  { %v260_v30 = vadd.f32 %v259_v27, %v219_v29  ;;  %v1274_v27 = vld [vmem:[#allocation4 + $0xc8] sm:$0xff]  ;;  %v1279_v29 = vld [vmem:[#allocation4 + $0xb8] sm:$0xff] }
 0x14b   :  { %v1212_v31 = vmax.f32 %v260_v30, 0.0  ;;  %v1283_v30 = vld [vmem:[#allocation4 + $0xb0] sm:$0xff] }
 0x14d   :  { %279 = vst [vmem:[%s1463_s10 + $0x30] sm:$0xff] %v1212_v31 }
 0x14e   :  { %v221_v32 = vpop.f32.mrf.mxu1 }
 0x14f   :  { %v222_v36 = vadd.f32 %v800_v58, %v221_v32  ;;  %v336_v58 = vld [vmem:[#allocation2 + $0x70] sm:$0xff]  ;;  %v1288_v32 = vld [vmem:[#allocation4 + $0xa0] sm:$0xff] }
 0x150   :  { %359 = vmatpush.msrb.mxu0 %v336_v58 }
 0x151   :  { %v263_v37 = vadd.f32 %v262_v35, %v222_v36  ;;  %v1292_v35 = vld [vmem:[#allocation4 + $0x98] sm:$0xff]  ;;  %v1295_v36 = vld [vmem:[#allocation4 + $0x90] sm:$0xff] }
 0x152   :  { %360 = vmatpush.msrb.mxu0 %v335_v59 }
 0x153   :  { %v1218_v38 = vmax.f32 %v263_v37, 0.0  ;;  %v1298_v37 = vld [vmem:[#allocation4 + $0x88] sm:$0xff] }
 0x154   :  { %361 = vmatpush.msrb.mxu0 %v334_v60 }
 0x155   :  { %280 = vst [vmem:[%s1463_s10 + $0x38] sm:$0xff] %v1218_v38  ;;  %289 = vmatpush.msrb.mxu3 %v1218_v38 }
 0x156   :  { %362 = vmatpush.msrb.mxu0 %v333_v61 }
 0x157   :  { %290 = vmatpush.msrb.mxu3 %v1212_v31 }
 0x158   :  { %363 = vmatpush.msrb.mxu0 %v332_v63 }
 0x159   :  { %291 = vmatpush.msrb.mxu3 %v1206_v26 }
 0x15a   :  { %364 = vmatpush.msrb.mxu0 %v331_v0 }
 0x15b   :  { %292 = vmatpush.msrb.mxu3 %v1200_v20 }
 0x15c   :  { %365 = vmatpush.msrb.mxu0 %v330_v1 }
 0x15d   :  { %293 = vmatpush.msrb.mxu3 %v1194_v15 }
 0x15f   :  { %294 = vmatpush.msrb.mxu3 %v1188_v8 }
 0x161   :  { %295 = vmatpush.msrb.mxu3 %v1182_v3 }
 0x163   :  { %296 = vmatpush.msrb.mxu3 %v1176_v62 }
 0x164   :  { %756 = vmatmul.msk.f32.vlgmr.msrb.gmra.mxu3 %vm81_vm0, %v1028_v13 }
 0x165   :  { %399 = vmatpush.msra.mxu3 %v353_v39 }
 0x167   :  { %400 = vmatpush.msra.mxu3 %v352_v40  ;;  %v801_v40 = vld [vmem:[%s1458_s5] ss:$0 sm:$0xff] }
 0x169   :  { %401 = vmatpush.msra.mxu3 %v351_v41 }
 0x16b   :  { %402 = vmatpush.msra.mxu3 %v350_v42 }
 0x16c   :  { %757 = vmatmul.msk.f32.gmra.mxu3 %vm81_vm0, %v1069_v23 }
 0x16d   :  { %403 = vmatpush.msra.mxu3 %v349_v45 }
 0x16f   :  { %404 = vmatpush.msra.mxu3 %v348_v46 }
 0x171   :  { %405 = vmatpush.msra.mxu3 %v347_v47 }
 0x173   :  { %406 = vmatpush.msra.mxu3 %v346_v48 }
 0x174   :  { %758 = vmatmul.msk.f32.gmra.mxu3 %vm81_vm0, %v1107_v33 }
 0x175   :  { %407 = vmatpush.msra.mxu3 %v345_v49 }
 0x177   :  { %408 = vmatpush.msra.mxu3 %v344_v50 }
 0x179   :  { %409 = vmatpush.msra.mxu3 %v343_v51 }
 0x17b   :  { %410 = vmatpush.msra.mxu3 %v342_v52 }
 0x17c   :  { %759 = vmatmul.msk.f32.gmra.mxu3 %vm81_vm0, %v1145_v43 }
 0x17d   :  { %411 = vmatpush.msra.mxu3 %v341_v53 }
 0x17f   :  { %412 = vmatpush.msra.mxu3 %v340_v54 }
 0x181   :  { %413 = vmatpush.msra.mxu3 %v339_v55 }
 0x183   :  { %414 = vmatpush.msra.mxu3 %v338_v56 }
 0x184   :  { %760 = vmatmul.msk.f32.gmra.mxu3 %vm81_vm0, %v1034_v14 }
 0x18c   :  { %761 = vmatmul.msk.f32.gmra.mxu3 %vm81_vm0, %v1074_v24 }
 0x194   :  { %762 = vmatmul.msk.f32.gmra.mxu3 %vm81_vm0, %v1112_v34 }
 0x19c   :  { %763 = vmatmul.msk.f32.gmra.mxu3 %vm81_vm0, %v1150_v44 }
 0x1a4   :  { %415 = vmatmul.f32.vlgmr.msra.gmra.mxu3 %v1176_v62  ;;  %v329_v62 = vld [vmem:[#allocation2 + $0x38] sm:$0xff] }
 0x1a5   :  { %366 = vmatpush.msrb.mxu0 %v329_v62 }
 0x1a7   :  { %367 = vmatpush.msrb.mxu0 %v328_v2 }
 0x1ac   :  { %418 = vmatmul.f32.gmra.mxu3 %v1182_v3  ;;  %v327_v3 = vld [vmem:[#allocation2 + $0x28] sm:$0xff] }
 0x1ad   :  { %368 = vmatpush.msrb.mxu0 %v327_v3 }
 0x1af   :  { %369 = vmatpush.msrb.mxu0 %v326_v4 }
 0x1b1   :  { %370 = vmatpush.msrb.mxu0 %v325_v5 }
 0x1b3   :  { %371 = vmatpush.msrb.mxu0 %v324_v6 }
 0x1b4   :  { %421 = vmatmul.f32.gmra.mxu3 %v1188_v8  ;;  %v322_v8 = vld [vmem:[#allocation2] sm:$0xff] }
 0x1b5   :  { %372 = vmatpush.msrb.mxu0 %v323_v7 }
 0x1b7   :  { %373 = vmatpush.msrb.mxu0 %v322_v8 }
 0x1b9   :  { %574 = vmatpush.msra.mxu0 %v1256_v19 }
 0x1bc   :  { %424 = vmatmul.f32.gmra.mxu3 %v1194_v15 }
 0x1c4   :  { %427 = vmatmul.f32.gmra.mxu3 %v1200_v20  ;;  %v1259_v20 = vld [vmem:[#allocation4 + $0xf0] sm:$0xff] }
 0x1c5   :  { %575 = vmatpush.msra.mxu0 %v1259_v20 }
 0x1c7   :  { %576 = vmatpush.msra.mxu0 %v1262_v21 }
 0x1c9   :  { %577 = vmatpush.msra.mxu0 %v1264_v22 }
 0x1cb   :  { %578 = vmatpush.msra.mxu0 %v1267_v25 }
 0x1cc   :  { %430 = vmatmul.f32.gmra.mxu3 %v1206_v26  ;;  %v1271_v26 = vld [vmem:[#allocation4 + $0xd0] sm:$0xff] }
 0x1cd   :  { %579 = vmatpush.msra.mxu0 %v1271_v26 }
 0x1cf   :  { %580 = vmatpush.msra.mxu0 %v1274_v27 }
 0x1d1   :  { %581 = vmatpush.msra.mxu0 %v1276_v28 }
 0x1d3   :  { %582 = vmatpush.msra.mxu0 %v1279_v29 }
 0x1d4   :  { %433 = vmatmul.f32.gmra.mxu3 %v1212_v31  ;;  %v1286_v31 = vld [vmem:[#allocation4 + $0xa8] sm:$0xff] }
 0x1d5   :  { %583 = vmatpush.msra.mxu0 %v1283_v30 }
 0x1d7   :  { %584 = vmatpush.msra.mxu0 %v1286_v31 }
 0x1d9   :  { %585 = vmatpush.msra.mxu0 %v1288_v32 }
 0x1db   :  { %586 = vmatpush.msra.mxu0 %v1292_v35 }
 0x1dc   :  { %436 = vmatmul.f32.gmra.mxu3 %v1218_v38  ;;  %v1301_v38 = vld [vmem:[#allocation4 + $0x80] sm:$0xff] }
 0x1dd   :  { %587 = vmatpush.msra.mxu0 %v1295_v36 }
 0x1df   :  { %588 = vmatpush.msra.mxu0 %v1298_v37 }
 0x1e1   :  { %589 = vmatpush.msra.mxu0 %v1301_v38 }
 0x1e7   :  { %v298_v9 = vpop.f32.mrf.mxu3 }
 0x1e8   :  { %374 = vmatmul.f32.vlgmr.msrb.gmra.mxu0 %v298_v9 }
 0x1ef   :  { %v301_v10 = vpop.f32.mrf.mxu3 }
 0x1f0   :  { %377 = vmatmul.f32.gmra.mxu0 %v301_v10 }
 0x1f7   :  { %v304_v11 = vpop.f32.mrf.mxu3 }
 0x1f8   :  { %380 = vmatmul.f32.gmra.mxu0 %v304_v11 }
 0x1ff   :  { %v307_v12 = vpop.f32.mrf.mxu3 }
 0x200   :  { %383 = vmatmul.f32.gmra.mxu0 %v307_v12 }
 0x207   :  { %v310_v15 = vpop.f32.mrf.mxu3 }
 0x208   :  { %386 = vmatmul.f32.gmra.mxu0 %v310_v15 }
 0x20f   :  { %v313_v16 = vpop.f32.mrf.mxu3 }
 0x210   :  { %389 = vmatmul.f32.gmra.mxu0 %v313_v16 }
 0x217   :  { %v316_v17 = vpop.f32.mrf.mxu3 }
 0x218   :  { %392 = vmatmul.f32.gmra.mxu0 %v316_v17 }
 0x21f   :  { %v319_v18 = vpop.f32.mrf.mxu3 }
 0x220   :  { %395 = vmatmul.f32.gmra.mxu0 %v319_v18 }
 0x227   :  { %v416_v39 = vpop.f32.mrf.mxu3 }
 0x22f   :  { %v419_v41 = vpop.f32.mrf.mxu3 }
 0x237   :  { %v422_v48 = vpop.f32.mrf.mxu3 }
 0x23f   :  { %v425_v55 = vpop.f32.mrf.mxu3 }
 0x247   :  { %v428_v61 = vpop.f32.mrf.mxu3 }
 0x24f   :  { %v431_v3 = vpop.f32.mrf.mxu3 }
 0x257   :  { %v434_v8 = vpop.f32.mrf.mxu3 }
 0x25f   :  { %v437_v17 = vpop.f32.mrf.mxu3 }
 0x265   :  { %v375_v42 = vpop.f32.mrf.mxu0 }
 0x266   :  { %v376_v45 = vadd.f32 %v801_v40, %v375_v42  ;;  %v802_v42 = vld [vmem:[%s1460_s7] ss:$0 sm:$0xff] }
 0x268   :  { %v417_v46 = vadd.f32 %v416_v39, %v376_v45 }
 0x26a   :  { %v440_v47 = vmax.f32 %v417_v46, 0.0 }
 0x26c   :  { %448 = vst [vmem:[%s1464_s11] sm:$0xff] %v440_v47  ;;  %590 = vmatmul.f32.vlgmr.msra.gmra.mxu0 %v440_v47 }
 0x26d   :  { %v378_v49 = vpop.f32.mrf.mxu0 }
 0x26e   :  { %v379_v50 = vadd.f32 %v801_v40, %v378_v49 }
 0x270   :  { %v420_v51 = vadd.f32 %v419_v41, %v379_v50  ;;  %v623_v41 = vlaneseq }
 0x272   :  { %v441_v52 = vmax.f32 %v420_v51, 0.0  ;;  %v1366_v45 = vand.u32 127, %v623_v41 }
 0x274   :  { %449 = vst [vmem:[%s1464_s11 + $0x8] sm:$0xff] %v441_v52  ;;  %593 = vmatmul.f32.gmra.mxu0 %v441_v52  ;;  %vm625_vm1 = vcmp.lt.s32.totalorder %v1366_v45, 8 }
 0x275   :  { %v381_v53 = vpop.f32.mrf.mxu0 }
 0x276   :  { %v382_v54 = vadd.f32 %v801_v40, %v381_v53 }
 0x278   :  { %v423_v56 = vadd.f32 %v422_v48, %v382_v54 }
 0x27a   :  { %v442_v57 = vmax.f32 %v423_v56, 0.0 }
 0x27c   :  { %450 = vst [vmem:[%s1464_s11 + $0x10] sm:$0xff] %v442_v57  ;;  %596 = vmatmul.f32.gmra.mxu0 %v442_v57 }
 0x27d   :  { %v384_v58 = vpop.f32.mrf.mxu0 }
 0x27e   :  { %v385_v59 = vadd.f32 %v801_v40, %v384_v58 }
 0x280   :  { %v426_v60 = vadd.f32 %v425_v55, %v385_v59 }
 0x282   :  { %v443_v63 = vmax.f32 %v426_v60, 0.0 }
 0x284   :  { %451 = vst [vmem:[%s1464_s11 + $0x18] sm:$0xff] %v443_v63  ;;  %599 = vmatmul.f32.gmra.mxu0 %v443_v63 }
 0x285   :  { %v387_v0 = vpop.f32.mrf.mxu0 }
 0x286   :  { %v388_v1 = vadd.f32 %v801_v40, %v387_v0 }
 0x288   :  { %v429_v62 = vadd.f32 %v428_v61, %v388_v1 }
 0x28a   :  { %v444_v2 = vmax.f32 %v429_v62, 0.0 }
 0x28c   :  { %452 = vst [vmem:[%s1464_s11 + $0x20] sm:$0xff] %v444_v2  ;;  %602 = vmatmul.f32.gmra.mxu0 %v444_v2 }
 0x28d   :  { %v390_v4 = vpop.f32.mrf.mxu0 }
 0x28e   :  { %v391_v5 = vadd.f32 %v801_v40, %v390_v4 }
 0x290   :  { %v432_v6 = vadd.f32 %v431_v3, %v391_v5 }
 0x292   :  { %v445_v7 = vmax.f32 %v432_v6, 0.0 }
 0x294   :  { %453 = vst [vmem:[%s1464_s11 + $0x28] sm:$0xff] %v445_v7  ;;  %605 = vmatmul.f32.gmra.mxu0 %v445_v7 }
 0x295   :  { %v393_v9 = vpop.f32.mrf.mxu0 }
 0x296   :  { %v394_v10 = vadd.f32 %v801_v40, %v393_v9 }
 0x298   :  { %v435_v11 = vadd.f32 %v434_v8, %v394_v10 }
 0x29a   :  { %v446_v12 = vmax.f32 %v435_v11, 0.0 }
 0x29c   :  { %454 = vst [vmem:[%s1464_s11 + $0x30] sm:$0xff] %v446_v12  ;;  %608 = vmatmul.f32.gmra.mxu0 %v446_v12 }
 0x29d   :  { %v396_v15 = vpop.f32.mrf.mxu0 }
 0x29e   :  { %v397_v16 = vadd.f32 %v801_v40, %v396_v15 }
 0x2a0   :  { %v438_v18 = vadd.f32 %v437_v17, %v397_v16 }
 0x2a2   :  { %v447_v39 = vmax.f32 %v438_v18, 0.0 }
 0x2a4   :  { %455 = vst [vmem:[%s1464_s11 + $0x38] sm:$0xff] %v447_v39  ;;  %464 = vmatpush.msrb.mxu1 %v447_v39 }
 0x2a6   :  { %465 = vmatpush.msrb.mxu1 %v446_v12 }
 0x2a8   :  { %466 = vmatpush.msrb.mxu1 %v445_v7 }
 0x2aa   :  { %467 = vmatpush.msrb.mxu1 %v444_v2 }
 0x2ac   :  { %468 = vmatpush.msrb.mxu1 %v443_v63 }
 0x2ae   :  { %469 = vmatpush.msrb.mxu1 %v442_v57 }
 0x2b0   :  { %470 = vmatpush.msrb.mxu1 %v441_v52 }
 0x2b2   :  { %471 = vmatpush.msrb.mxu1 %v440_v47 }
 0x2b3   :  { %764 = vmatmul.msk.f32.vlgmr.msrb.gmra.mxu1 %vm81_vm0, %v1028_v13  ;;  %v512_v13 = vld [vmem:[#allocation4 + $0x78] sm:$0xff] }
 0x2b4   :  { %780 = vmatpush.msra.mxu1 %v1256_v19  ;;  %533 = vmatpush.msrb.mxu2 %v512_v13  ;;  %v508_v19 = vld [vmem:[#allocation4 + $0x58] sm:$0xff] }
 0x2b6   :  { %781 = vmatpush.msra.mxu1 %v1259_v20  ;;  %v506_v20 = vld [vmem:[#allocation4 + $0x48] sm:$0xff] }
 0x2b8   :  { %782 = vmatpush.msra.mxu1 %v1262_v21  ;;  %v503_v21 = vld [vmem:[#allocation4 + $0x30] sm:$0xff] }
 0x2ba   :  { %783 = vmatpush.msra.mxu1 %v1264_v22  ;;  %v501_v22 = vld [vmem:[#allocation4 + $0x20] sm:$0xff] }
 0x2bb   :  { %765 = vmatmul.msk.f32.gmra.mxu1 %vm81_vm0, %v1069_v23  ;;  %v511_v23 = vld [vmem:[#allocation4 + $0x70] sm:$0xff] }
 0x2bc   :  { %784 = vmatpush.msra.mxu1 %v1267_v25  ;;  %534 = vmatpush.msrb.mxu2 %v511_v23  ;;  %v500_v25 = vld [vmem:[#allocation4 + $0x18] sm:$0xff] }
 0x2be   :  { %785 = vmatpush.msra.mxu1 %v1271_v26  ;;  %v499_v26 = vld [vmem:[#allocation4 + $0x10] sm:$0xff] }
 0x2c0   :  { %786 = vmatpush.msra.mxu1 %v1274_v27  ;;  %v498_v27 = vld [vmem:[#allocation4 + $0x8] sm:$0xff] }
 0x2c2   :  { %787 = vmatpush.msra.mxu1 %v1276_v28  ;;  %v497_v28 = vld [vmem:[#allocation4] sm:$0xff] }
 0x2c3   :  { %766 = vmatmul.msk.f32.gmra.mxu1 %vm81_vm0, %v1107_v33  ;;  %v510_v33 = vld [vmem:[#allocation4 + $0x68] sm:$0xff] }
 0x2c4   :  { %788 = vmatpush.msra.mxu1 %v1279_v29  ;;  %535 = vmatpush.msrb.mxu2 %v510_v33 }
 0x2c6   :  { %789 = vmatpush.msra.mxu1 %v1283_v30 }
 0x2c8   :  { %790 = vmatpush.msra.mxu1 %v1286_v31 }
 0x2ca   :  { %791 = vmatpush.msra.mxu1 %v1288_v32 }
 0x2cb   :  { %767 = vmatmul.msk.f32.gmra.mxu1 %vm81_vm0, %v1145_v43  ;;  %v509_v43 = vld [vmem:[#allocation4 + $0x60] sm:$0xff] }
 0x2cc   :  { %792 = vmatpush.msra.mxu1 %v1292_v35  ;;  %536 = vmatpush.msrb.mxu2 %v509_v43 }
 0x2ce   :  { %793 = vmatpush.msra.mxu1 %v1295_v36  ;;  %537 = vmatpush.msrb.mxu2 %v508_v19 }
 0x2d0   :  { %794 = vmatpush.msra.mxu1 %v1298_v37 }
 0x2d2   :  { %795 = vmatpush.msra.mxu1 %v1301_v38 }
 0x2d3   :  { %768 = vmatmul.msk.f32.gmra.mxu1 %vm81_vm0, %v1034_v14  ;;  %v507_v14 = vld [vmem:[#allocation4 + $0x50] sm:$0xff] }
 0x2d4   :  { %538 = vmatpush.msrb.mxu2 %v507_v14 }
 0x2d6   :  { %539 = vmatpush.msrb.mxu2 %v506_v20 }
 0x2db   :  { %769 = vmatmul.msk.f32.gmra.mxu1 %vm81_vm0, %v1074_v24  ;;  %v505_v24 = vld [vmem:[#allocation4 + $0x40] sm:$0xff] }
 0x2dc   :  { %540 = vmatpush.msrb.mxu2 %v505_v24 }
 0x2e3   :  { %770 = vmatmul.msk.f32.gmra.mxu1 %vm81_vm0, %v1112_v34  ;;  %v504_v34 = vld [vmem:[#allocation4 + $0x38] sm:$0xff] }
 0x2e4   :  { %541 = vmatpush.msrb.mxu2 %v504_v34 }
 0x2e6   :  { %542 = vmatpush.msrb.mxu2 %v503_v21 }
 0x2e9   :  { %v591_v40 = vpop.f32.mrf.mxu0 }
 0x2eb   :  { %771 = vmatmul.msk.f32.gmra.mxu1 %vm81_vm0, %v1150_v44  ;;  %v502_v44 = vld [vmem:[#allocation4 + $0x28] sm:$0xff] }
 0x2ec   :  { %543 = vmatpush.msrb.mxu2 %v502_v44 }
 0x2ee   :  { %544 = vmatpush.msrb.mxu2 %v501_v22 }
 0x2f0   :  { %545 = vmatpush.msrb.mxu2 %v500_v25 }
 0x2f1   :  { %v594_v46 = vpop.f32.mrf.mxu0 }
 0x2f2   :  { %546 = vmatpush.msrb.mxu2 %v499_v26 }
 0x2f3   :  { %611 = vmatmul.f32.vlgmr.msra.gmra.mxu1 %v447_v39 }
 0x2f4   :  { %547 = vmatpush.msrb.mxu2 %v498_v27 }
 0x2f6   :  { %548 = vmatpush.msrb.mxu2 %v497_v28 }
 0x2f9   :  { %v597_v53 = vpop.f32.mrf.mxu0 }
 0x301   :  { %v600_v59 = vpop.f32.mrf.mxu0 }
 0x309   :  { %v603_v62 = vpop.f32.mrf.mxu0 }
 0x311   :  { %v606_v6 = vpop.f32.mrf.mxu0 }
 0x319   :  { %v609_v15 = vpop.f32.mrf.mxu0 }
 0x330   :  { %v473_v29 = vpop.f32.mrf.mxu1 }
 0x331   :  { %549 = vmatmul.f32.vlgmr.msrb.gmra.mxu2 %v473_v29 }
 0x338   :  { %v476_v30 = vpop.f32.mrf.mxu1 }
 0x339   :  { %552 = vmatmul.f32.gmra.mxu2 %v476_v30 }
 0x340   :  { %v479_v31 = vpop.f32.mrf.mxu1 }
 0x341   :  { %555 = vmatmul.f32.gmra.mxu2 %v479_v31 }
 0x348   :  { %v482_v32 = vpop.f32.mrf.mxu1 }
 0x349   :  { %558 = vmatmul.f32.gmra.mxu2 %v482_v32 }
 0x350   :  { %v485_v35 = vpop.f32.mrf.mxu1 }
 0x351   :  { %561 = vmatmul.f32.gmra.mxu2 %v485_v35 }
 0x358   :  { %v488_v36 = vpop.f32.mrf.mxu1 }
 0x359   :  { %564 = vmatmul.f32.gmra.mxu2 %v488_v36 }
 0x360   :  { %v491_v37 = vpop.f32.mrf.mxu1 }
 0x361   :  { %567 = vmatmul.f32.gmra.mxu2 %v491_v37 }
 0x368   :  { %v494_v38 = vpop.f32.mrf.mxu1 }
 0x369   :  { %570 = vmatmul.f32.gmra.mxu2 %v494_v38 }
 0x370   :  { %v612_v13 = vpop.f32.mrf.mxu1 }
 0x3b4   :  { %v550_v47 = vpop.f32.mrf.mxu2 }
 0x3b5   :  { %v551_v48 = vadd.f32 %v802_v42, %v550_v47 }
 0x3b7   :  { %v592_v49 = vadd.f32 %v591_v40, %v551_v48 }
 0x3b9   :  { %v626_v50 = vsel %vm625_vm1, %v592_v49, -inf  ;;  %615 = vst [vmem:[%s1461_s8] sm:$0xff] %v592_v49 }
 0x3ba   :  { %634 = vmax.xlane.f32.xlu0 %v626_v50 }
 0x3bc   :  { %v553_v51 = vpop.f32.mrf.mxu2 }
 0x3bd   :  { %v554_v52 = vadd.f32 %v802_v42, %v553_v51 }
 0x3bf   :  { %v595_v54 = vadd.f32 %v594_v46, %v554_v52 }
 0x3c1   :  { %v627_v55 = vsel %vm625_vm1, %v595_v54, -inf  ;;  %616 = vst [vmem:[%s1461_s8 + $0x8] sm:$0xff] %v595_v54 }
 0x3c2   :  { %636 = vmax.xlane.f32.xlu0 %v627_v55 }
 0x3c4   :  { %v556_v56 = vpop.f32.mrf.mxu2 }
 0x3c5   :  { %v557_v57 = vadd.f32 %v802_v42, %v556_v56 }
 0x3c7   :  { %v598_v58 = vadd.f32 %v597_v53, %v557_v57 }
 0x3c9   :  { %v628_v60 = vsel %vm625_vm1, %v598_v58, -inf  ;;  %617 = vst [vmem:[%s1461_s8 + $0x10] sm:$0xff] %v598_v58 }
 0x3ca   :  { %638 = vmax.xlane.f32.xlu1 %v628_v60 }
 0x3cc   :  { %v559_v61 = vpop.f32.mrf.mxu2 }
 0x3cd   :  { %v560_v63 = vadd.f32 %v802_v42, %v559_v61 }
 0x3cf   :  { %v601_v0 = vadd.f32 %v600_v59, %v560_v63 }
 0x3d1   :  { %v629_v1 = vsel %vm625_vm1, %v601_v0, -inf  ;;  %618 = vst [vmem:[%s1461_s8 + $0x18] sm:$0xff] %v601_v0 }
 0x3d2   :  { %640 = vmax.xlane.f32.xlu1 %v629_v1 }
 0x3d4   :  { %v562_v2 = vpop.f32.mrf.mxu2 }
 0x3d5   :  { %v563_v3 = vadd.f32 %v802_v42, %v562_v2 }
 0x3d7   :  { %v604_v4 = vadd.f32 %v603_v62, %v563_v3 }
 0x3d9   :  { %v630_v5 = vsel %vm625_vm1, %v604_v4, -inf  ;;  %619 = vst [vmem:[%s1461_s8 + $0x20] sm:$0xff] %v604_v4 }
 0x3da   :  { %642 = vmax.xlane.f32.xlu2 %v630_v5 }
 0x3dc   :  { %v565_v7 = vpop.f32.mrf.mxu2 }
 0x3dd   :  { %v566_v8 = vadd.f32 %v802_v42, %v565_v7 }
 0x3df   :  { %v607_v9 = vadd.f32 %v606_v6, %v566_v8 }
 0x3e1   :  { %v631_v10 = vsel %vm625_vm1, %v607_v9, -inf  ;;  %620 = vst [vmem:[%s1461_s8 + $0x28] sm:$0xff] %v607_v9 }
 0x3e2   :  { %644 = vmax.xlane.f32.xlu2 %v631_v10 }
 0x3e4   :  { %v568_v11 = vpop.f32.mrf.mxu2 }
 0x3e5   :  { %v569_v12 = vadd.f32 %v802_v42, %v568_v11 }
 0x3e7   :  { %v610_v16 = vadd.f32 %v609_v15, %v569_v12 }
 0x3e9   :  { %v632_v17 = vsel %vm625_vm1, %v610_v16, -inf  ;;  %621 = vst [vmem:[%s1461_s8 + $0x30] sm:$0xff] %v610_v16 }
 0x3ea   :  { %646 = vmax.xlane.f32.xlu0 %v632_v17 }
 0x3ec   :  { %v571_v18 = vpop.f32.mrf.mxu2 }
 0x3ed   :  { %v572_v39 = vadd.f32 %v802_v42, %v571_v18 }
 0x3ef   :  { %v613_v23 = vadd.f32 %v612_v13, %v572_v39 }
 0x3f1   :  { %v633_v33 = vsel %vm625_vm1, %v613_v23, -inf  ;;  %622 = vst [vmem:[%s1461_s8 + $0x38] sm:$0xff] %v613_v23 }
 0x3f2   :  { %648 = vmax.xlane.f32.xlu1 %v633_v33 }
 0x42d   :  { %v635_v43 = vpop.xlane.xlu0 %634 }
 0x42e   :  { %v650_v19 = vsub.f32 %v626_v50, %v635_v43 }
 0x430   :  { %v658_v14 = vmul.f32 1.442695, %v650_v19 }
 0x432   :  { %803 = vpow2.f32 %v658_v14 }
 0x435   :  { %v637_v20 = vpop.xlane.xlu0 %636 }
 0x436   :  { %v651_v24 = vsub.f32 %v627_v55, %v637_v20 }
 0x438   :  { %v804_v34 = vpop.eup %803  ;;  %v660_v21 = vmul.f32 1.442695, %v651_v24 }
 0x439   :  { %674 = vadd.xlane.f32.xlu2 %v804_v34 }
 0x43a   :  { %805 = vpow2.f32 %v660_v21 }
 0x43d   :  { %v639_v44 = vpop.xlane.xlu1 %638 }
 0x43e   :  { %v652_v22 = vsub.f32 %v628_v60, %v639_v44 }
 0x440   :  { %v806_v25 = vpop.eup %805  ;;  %v662_v26 = vmul.f32 1.442695, %v652_v22 }
 0x441   :  { %676 = vadd.xlane.f32.xlu0 %v806_v25 }
 0x442   :  { %807 = vpow2.f32 %v662_v26 }
 0x445   :  { %v641_v27 = vpop.xlane.xlu1 %640 }
 0x446   :  { %v653_v28 = vsub.f32 %v629_v1, %v641_v27 }
 0x448   :  { %v808_v29 = vpop.eup %807  ;;  %v664_v30 = vmul.f32 1.442695, %v653_v28 }
 0x449   :  { %678 = vadd.xlane.f32.xlu1 %v808_v29 }
 0x44a   :  { %809 = vpow2.f32 %v664_v30 }
 0x44d   :  { %v643_v31 = vpop.xlane.xlu2 %642 }
 0x44e   :  { %v654_v32 = vsub.f32 %v630_v5, %v643_v31 }
 0x450   :  { %v810_v35 = vpop.eup %809  ;;  %v666_v36 = vmul.f32 1.442695, %v654_v32 }
 0x451   :  { %680 = vadd.xlane.f32.xlu2 %v810_v35 }
 0x452   :  { %811 = vpow2.f32 %v666_v36 }
 0x455   :  { %v645_v37 = vpop.xlane.xlu2 %644 }
 0x456   :  { %v655_v38 = vsub.f32 %v631_v10, %v645_v37 }
 0x458   :  { %v812_v40 = vpop.eup %811  ;;  %v668_v41 = vmul.f32 1.442695, %v655_v38 }
 0x459   :  { %682 = vadd.xlane.f32.xlu0 %v812_v40 }
 0x45a   :  { %813 = vpow2.f32 %v668_v41 }
 0x45d   :  { %v647_v42 = vpop.xlane.xlu0 %646 }
 0x45e   :  { %v1409_v46 = vsub.f32 %v632_v17, %v647_v42 }
 0x460   :  { %v814_v47 = vpop.eup %813  ;;  %v670_v48 = vmul.f32 1.442695, %v1409_v46 }
 0x461   :  { %684 = vadd.xlane.f32.xlu1 %v814_v47 }
 0x462   :  { %815 = vpow2.f32 %v670_v48 }
 0x465   :  { %v649_v49 = vpop.xlane.xlu1 %648 }
 0x466   :  { %v657_v50 = vsub.f32 %v633_v33, %v649_v49 }
 0x468   :  { %v816_v51 = vpop.eup %815  ;;  %v672_v52 = vmul.f32 1.442695, %v657_v50 }
 0x469   :  { %686 = vadd.xlane.f32.xlu2 %v816_v51 }
 0x46a   :  { %817 = vpow2.f32 %v672_v52 }
 0x470   :  { %v818_v53 = vpop.eup %817 }
 0x471   :  { %688 = vadd.xlane.f32.xlu0 %v818_v53 }
 0x4ac   :  { %v675_v54 = vpop.xlane.xlu2 %674 }
 0x4ad   :  { %819 = vlog2.f32 %v675_v54 }
 0x4b3   :  { %v820_v55 = vpop.eup %819 }
 0x4b4   :  { %v691_v56 = vmul.f32 0.6931472, %v820_v55  ;;  %v677_v57 = vpop.xlane.xlu0 %676 }
 0x4b5   :  { %821 = vlog2.f32 %v677_v57 }
 0x4b6   :  { %v706_v58 = vsub.f32 %v650_v19, %v691_v56 }
 0x4b8   :  { %v714_v59 = vsel %vm625_vm1, %v706_v58, 0.0 }
 0x4b9   :  { %722 = vst [vmem:[%s1462_s9] sm:$0xff] %v714_v59 }
 0x4bb   :  { %v822_v60 = vpop.eup %821 }
 0x4bc   :  { %v693_v61 = vmul.f32 0.6931472, %v822_v60  ;;  %v679_v63 = vpop.xlane.xlu1 %678 }
 0x4bd   :  { %823 = vlog2.f32 %v679_v63 }
 0x4be   :  { %v707_v0 = vsub.f32 %v651_v24, %v693_v61 }
 0x4c0   :  { %v715_v1 = vsel %vm625_vm1, %v707_v0, 0.0 }
 0x4c1   :  { %723 = vst [vmem:[%s1462_s9 + $0x8] sm:$0xff] %v715_v1 }
 0x4c3   :  { %v824_v62 = vpop.eup %823 }
 0x4c4   :  { %v695_v2 = vmul.f32 0.6931472, %v824_v62  ;;  %v681_v3 = vpop.xlane.xlu2 %680 }
 0x4c5   :  { %825 = vlog2.f32 %v681_v3 }
 0x4c6   :  { %v708_v4 = vsub.f32 %v652_v22, %v695_v2 }
 0x4c8   :  { %v716_v5 = vsel %vm625_vm1, %v708_v4, 0.0 }
 0x4c9   :  { %724 = vst [vmem:[%s1462_s9 + $0x10] sm:$0xff] %v716_v5 }
 0x4cb   :  { %v826_v6 = vpop.eup %825 }
 0x4cc   :  { %v697_v7 = vmul.f32 0.6931472, %v826_v6  ;;  %v683_v8 = vpop.xlane.xlu0 %682 }
 0x4cd   :  { %827 = vlog2.f32 %v683_v8 }
 0x4ce   :  { %v709_v9 = vsub.f32 %v653_v28, %v697_v7 }
 0x4d0   :  { %v717_v10 = vsel %vm625_vm1, %v709_v9, 0.0 }
 0x4d1   :  { %725 = vst [vmem:[%s1462_s9 + $0x18] sm:$0xff] %v717_v10 }
 0x4d3   :  { %v828_v11 = vpop.eup %827 }
 0x4d4   :  { %v699_v12 = vmul.f32 0.6931472, %v828_v11  ;;  %v685_v15 = vpop.xlane.xlu1 %684 }
 0x4d5   :  { %829 = vlog2.f32 %v685_v15 }
 0x4d6   :  { %v710_v16 = vsub.f32 %v654_v32, %v699_v12 }
 0x4d8   :  { %v718_v17 = vsel %vm625_vm1, %v710_v16, 0.0 }
 0x4d9   :  { %726 = vst [vmem:[%s1462_s9 + $0x20] sm:$0xff] %v718_v17 }
 0x4db   :  { %v830_v18 = vpop.eup %829 }
 0x4dc   :  { %v701_v39 = vmul.f32 0.6931472, %v830_v18  ;;  %v687_v13 = vpop.xlane.xlu2 %686 }
 0x4dd   :  { %831 = vlog2.f32 %v687_v13 }
 0x4de   :  { %v711_v23 = vsub.f32 %v655_v38, %v701_v39 }
 0x4e0   :  { %v719_v33 = vsel %vm625_vm1, %v711_v23, 0.0 }
 0x4e1   :  { %727 = vst [vmem:[%s1462_s9 + $0x28] sm:$0xff] %v719_v33 }
 0x4e3   :  { %v832_v43 = vpop.eup %831 }
 0x4e4   :  { %v703_v19 = vmul.f32 0.6931472, %v832_v43  ;;  %v689_v14 = vpop.xlane.xlu0 %688 }
 0x4e5   :  { %833 = vlog2.f32 %v689_v14 }
 0x4e6   :  { %v712_v20 = vsub.f32 %v1409_v46, %v703_v19 }
 0x4e8   :  { %v720_v24 = vsel %vm625_vm1, %v712_v20, 0.0 }
 0x4e9   :  { %728 = vst [vmem:[%s1462_s9 + $0x30] sm:$0xff] %v720_v24 }
 0x4eb   :  { %v834_v34 = vpop.eup %833 }
 0x4ec   :  { %v705_v21 = vmul.f32 0.6931472, %v834_v34 }
 0x4ee   :  { %v713_v44 = vsub.f32 %v657_v50, %v705_v21 }
 0x4f0   :  { %v721_v22 = vsel %vm625_vm1, %v713_v44, 0.0 }
 0x4f1   :  { %729 = vst [vmem:[%s1462_s9 + $0x38] sm:$0xff] %v721_v22 }
 0x4f2   :  { %746 = vsyncpa [#allocation3], 1 }
 0x4f3   :  { %747 = vsyncpa [#allocation5], 1 }

</bundles_post_ra>
